<compile_context>
chip_gen: v7x
topology: tpu7x:2x2x1
jax: 0.10.0
libtpu: 0.0.40
codegen_flags: <defaults>
</compile_context>

<pallas_src>
import functools
from typing import NamedTuple

import jax
import jax.numpy as jnp
from jax.experimental import pallas as pl
from jax.experimental.pallas import tpu as pltpu

# ReLU after torch layers 1,2,4,5  ->  0-based layer indices 0,1,3,4.
_RELU_LAYERS = (0, 1, 3, 4)
_MIN_PALLAS_ROWS = 64      # below this the MXU is nearly empty -> plain XLA path
_ROW_TILE_CAP = 512        # max rows per grid step


class Meta(NamedTuple):
    f_state: int
    id_length: int
    num_acts: int


def _round_up(x, m):
    return -(-x // m) * m


def _cdiv(a, b):
    return -(-a // b)


# ----------------------------------------------------------------------------
# One-time weight prepacking (fold no-ReLU pairs + block-diagonal packing).
# ----------------------------------------------------------------------------
def prepack_params(params):
    """params: list of 7 tuples (W, b), W: [id_length, out, in] (torch layout),
    b: [id_length, out].  Returns (packed_arrays_dict, Meta)."""
    assert len(params) == 7 and _RELU_LAYERS == (0, 1, 3, 4)
    id_length = params[0][0].shape[0]
    f_state = params[0][0].shape[2]
    num_acts = params[-1][0].shape[1]

    # [id, out, in] -> [id, in, out]   (row-vector form:  h @ Wt + b)
    wt = [jnp.transpose(w, (0, 2, 1)).astype(jnp.float32) for w, _ in params]
    bs = [b.astype(jnp.float32) for _, b in params]

    def fold(i, j):  # exact: no ReLU between torch layers i+1 and j+1
        w = jnp.einsum("aio,aon->ain", wt[i], wt[j])
        b = jnp.einsum("ao,aon->an", bs[i], wt[j]) + bs[j]
        return w, b

    w23, b23 = fold(2, 3)   # torch layers 3,4
    w56, b56 = fold(5, 6)   # torch layers 6,7
    # Effective layers: 0..3 are ReLU'd & block-diagonal, 4 is the collapsing one.
    eff = [(wt[0], bs[0]), (wt[1], bs[1]), (w23, b23), (wt[4], bs[4]), (w56, b56)]

    band = max(w.shape[2] for w, _ in eff[:-1])          # per-branch hidden width
    d = _round_up(id_length * band, 128)                 # packed hidden width
    outp = _round_up(num_acts, 128)                      # lane-dense output width
    fin = f_state + id_length                            # streamed input width
    # NOTE: this packing targets the common MARL regime (id_length*band <= ~512);
    # for very wide hidden layers a per-branch formulation becomes cheaper again.

    w1p = jnp.zeros((fin, d), jnp.float32)
    wmid = jnp.zeros((3, d, d), jnp.float32)
    wlast = jnp.zeros((d, outp), jnp.float32)
    bias = jnp.zeros((4, 1, d), jnp.float32)
    selb = jnp.zeros((fin, d + outp), jnp.float32)       # [band-mask | last bias]

    for a in range(id_length):
        lo = a * band
        w0, b0 = eff[0]
        w1p = w1p.at[:f_state, lo:lo + w0.shape[2]].set(w0[a])
        bias = bias.at[0, 0, lo:lo + w0.shape[2]].set(b0[a])
        for k in range(1, 4):
            wk, bk = eff[k]
            din, dout = wk.shape[1], wk.shape[2]
            wmid = wmid.at[k - 1, lo:lo + din, lo:lo + dout].set(wk[a])
            bias = bias.at[k, 0, lo:lo + dout].set(bk[a])
        wl, bl = eff[4]
        wlast = wlast.at[lo:lo + wl.shape[1], :num_acts].set(wl[a])
        selb = selb.at[f_state + a, lo:lo + band].set(1.0)
        selb = selb.at[f_state + a, d:d + num_acts].set(bl[a])

    packed = dict(w1=w1p.astype(jnp.bfloat16),
                  wmid=wmid.astype(jnp.bfloat16),
                  wlast=wlast.astype(jnp.bfloat16),
                  selb=selb.astype(jnp.bfloat16),
                  bias=bias)                              # biases stay f32
    return packed, Meta(f_state=f_state, id_length=id_length, num_acts=num_acts)


# ----------------------------------------------------------------------------
# Shared math (used inside the Pallas kernel and for the tiny-M XLA fallback).
# ----------------------------------------------------------------------------
def _mlp_math(x, w1, wmid, wlast, selb, bias):
    """x [M, Fin] bf16 (state + one-hot id lanes) -> logits [M, OUT_pad] f32."""
    h = jnp.dot(x, w1, preferred_element_type=jnp.float32) + bias[0]
    h = jnp.maximum(h, 0.0)
    for k in range(wmid.shape[0]):                        # static unroll (3)
        h = jnp.dot(h.astype(jnp.bfloat16), wmid[k],
                    preferred_element_type=jnp.float32) + bias[k + 1]
        h = jnp.maximum(h, 0.0)
    d = wlast.shape[0]
    # One tiny matmul on the input (the one-hot lanes drive it) yields the
    # per-row band mask (cols :d) and the selected last-layer bias (cols d:).
    sb = jnp.dot(x, selb, preferred_element_type=jnp.float32)
    h = jnp.where(sb[:, :d] > 0.5, h, 0.0)                # keep only own-id band
    return jnp.dot(h.astype(jnp.bfloat16), wlast,
                   preferred_element_type=jnp.float32) + sb[:, d:]


def _fused_mlp_kernel(x_ref, w1_ref, wmid_ref, wlast_ref, selb_ref, bias_ref,
                      out_ref):
    out_ref[...] = _mlp_math(x_ref[...], w1_ref[...], wmid_ref[...],
                             wlast_ref[...], selb_ref[...],
                             bias_ref[...]).astype(out_ref.dtype)


# ----------------------------------------------------------------------------
# pallas_call wrapper.
# ----------------------------------------------------------------------------
def _pallas_forward(x_pad, packed, tile_m):
    m_pad, fin = x_pad.shape
    w1, wmid, wlast = packed["w1"], packed["wmid"], packed["wlast"]
    selb, bias = packed["selb"], packed["bias"]
    n_mid, d, _ = wmid.shape
    outp = wlast.shape[1]
    n_bias = bias.shape[0]
    ntiles = m_pad // tile_m

    flops = 2 * m_pad * (fin * d + n_mid * d * d + fin * (d + outp) + d * outp)
    bytes_accessed = (x_pad.size * x_pad.dtype.itemsize
                      + w1.size * w1.dtype.itemsize
                      + wmid.size * wmid.dtype.itemsize
                      + wlast.size * wlast.dtype.itemsize
                      + selb.size * selb.dtype.itemsize
                      + bias.size * bias.dtype.itemsize
                      + m_pad * outp * 4)

    return pl.pallas_call(
        _fused_mlp_kernel,
        out_shape=jax.ShapeDtypeStruct((m_pad, outp), jnp.float32),
        grid=(ntiles,),
        in_specs=[
            pl.BlockSpec((tile_m, fin), lambda i: (i, 0)),          # streamed rows
            pl.BlockSpec((fin, d), lambda i: (0, 0)),               # pinned weights
            pl.BlockSpec((n_mid, d, d), lambda i: (0, 0, 0)),
            pl.BlockSpec((d, outp), lambda i: (0, 0)),
            pl.BlockSpec((fin, d + outp), lambda i: (0, 0)),
            pl.BlockSpec((n_bias, 1, d), lambda i: (0, 0, 0)),
        ],
        out_specs=pl.BlockSpec((tile_m, outp), lambda i: (i, 0)),   # lane-dense out
        compiler_params=pltpu.CompilerParams(
            dimension_semantics=("parallel",)),
        cost_estimate=pl.CostEstimate(flops=int(flops), transcendentals=0,
                                      bytes_accessed=int(bytes_accessed)),
    )(x_pad, w1, wmid, wlast, selb, bias)


def agent_network_forward(inp, packed, *, meta):
    """inp: [B, N, obs_dim + obs_u_dim]; packed/meta from prepack_params."""
    B, N, f_total = inp.shape
    f_state, id_length, num_acts = meta.f_state, meta.id_length, meta.num_acts
    assert f_total == f_state + id_length
    M = B * N

    # Hard one-hot selector (exact torch argmax semantics) packed into the
    # trailing lanes of the streamed input -- no separate selector stream.
    ids = jnp.argmax(inp[..., f_state:], axis=-1)
    onehot = jax.nn.one_hot(ids, id_length, dtype=jnp.bfloat16)
    x = jnp.concatenate([inp[..., :f_state].astype(jnp.bfloat16), onehot], axis=-1)
    x = x.reshape(M, f_total)

    if M < _MIN_PALLAS_ROWS:
        # Tiny batches: per-grid-step overhead dominates -> plain XLA path.
        out = _mlp_math(x, packed["w1"], packed["wmid"], packed["wlast"],
                        packed["selb"], packed["bias"])
        return out[:, :num_acts].reshape(B, N, num_acts)

    # Row tiling: >=2 tiles when M >= 256 (v7x dual TensorCore), cdiv-based
    # tile size to bound padding waste, rows rounded to the sublane multiple.
    ntiles = max(_cdiv(M, _ROW_TILE_CAP), 2 if M >= 256 else 1)
    tile_m = _round_up(_cdiv(M, ntiles), 8)
    m_pad = tile_m * ntiles
    if m_pad != M:
        x = jnp.zeros((m_pad, f_total), x.dtype).at[:M].set(x)

    out = _pallas_forward(x, packed, tile_m)
    return out[:M, :num_acts].reshape(B, N, num_acts)


# ----------------------------------------------------------------------------
# Pure-JAX reference and deterministic init (for in-script verification only).
# ----------------------------------------------------------------------------
def _reference_forward(inp, params, id_length):
    B, N, _ = inp.shape
    M = B * N
    ids = jnp.argmax(inp[..., -id_length:], axis=-1).reshape(M)
    h = inp[..., :-id_length].reshape(M, -1).astype(jnp.float32)
    for l, (w, b) in enumerate(params):
        wg = w[ids]                                  # [M, out, in]  (torch.gather)
        bg = b[ids]                                  # [M, out]
        h = jnp.einsum('mi,moi->mo', h, wg) + bg     # bmm with per-row weights
        if l in _RELU_LAYERS:
            h = jnp.maximum(h, 0.0)
    return h.reshape(B, N, -1)


def _init_layer_stack(key, id_length, in_dim, out_dim):
    """Mimics nn.Linear init (uniform +-1/sqrt(in)), stacked over the ModuleList."""
    kw, kb = jax.random.split(key)
    bound = 1.0 / jnp.sqrt(jnp.float32(in_dim))
    w = jax.random.uniform(kw, (id_length, out_dim, in_dim), jnp.float32, -bound, bound)
    b = jax.random.uniform(kb, (id_length, out_dim), jnp.float32, -bound, bound)
    return w, b


if __name__ == "__main__":
    # Small shapes consistent with the module's constructor.
    obs_dim, obs_u_dim, id_length = 20, 16, 4         # state features = 32
    mid_dim1 = mid_dim2 = gnn_hdim1 = gnn_hdim2 = gnn_out_dim = 32
    num_acts = 8
    batch_size, num_agents = 32, 8                    # M = 256 rows -> 2-tile grid

    key = jax.random.PRNGKey(0)
    k_state, k_par = jax.random.split(key)

    F_state = obs_dim + obs_u_dim - id_length
    state = jax.random.normal(k_state, (batch_size, num_agents, F_state), jnp.float32)
    agent_ids = jnp.arange(num_agents, dtype=jnp.int32) % id_length
    onehot = jax.nn.one_hot(agent_ids, id_length, dtype=jnp.float32)
    onehot = jnp.broadcast_to(onehot[None], (batch_size, num_agents, id_length))
    inp = jnp.concatenate([state, onehot], axis=-1)   # [B, N, obs_dim + obs_u_dim]

    layer_dims = [(F_state, mid_dim1), (mid_dim1, mid_dim2), (mid_dim2, mid_dim2),
                  (mid_dim2, gnn_hdim1), (gnn_hdim1, gnn_hdim2),
                  (gnn_hdim2, gnn_out_dim), (gnn_out_dim, num_acts)]
    keys = jax.random.split(k_par, len(layer_dims))
    params = [_init_layer_stack(keys[l], id_length, din, dout)
              for l, (din, dout) in enumerate(layer_dims)]

    # One-time prepack (fold + block-diag + bf16 cast) outside the jitted forward.
    packed, meta = prepack_params(params)
    fwd = jax.jit(functools.partial(agent_network_forward, meta=meta))

    act_logits = fwd(inp, packed)
    jax.block_until_ready(act_logits)

    ref = _reference_forward(inp, params, id_length)
    assert act_logits.shape == (batch_size, num_agents, num_acts)
    max_err = float(jnp.max(jnp.abs(act_logits - ref)))
    # bf16 matmul operands (f32 accumulation) -> allow bf16-level tolerance.
    assert jnp.allclose(act_logits, ref, atol=2e-2, rtol=2e-2), f"max abs err {max_err}"

    print("KERNEL_OK")
</pallas_src>

<mosaic_0001>
module attributes {stable_mosaic.version = 11 : i64} {
  func.func @_fused_mlp_kernel(%arg0: i32, %arg1: memref<128x36xbf16, #tpu.memory_space<vmem>>, %arg2: memref<36x128xbf16, #tpu.memory_space<vmem>>, %arg3: memref<3x128x128xbf16, #tpu.memory_space<vmem>>, %arg4: memref<128x128xbf16, #tpu.memory_space<vmem>>, %arg5: memref<36x256xbf16, #tpu.memory_space<vmem>>, %arg6: memref<4x1x128xf32, #tpu.memory_space<vmem>>, %arg7: memref<128x128xf32, #tpu.memory_space<vmem>>) attributes {dimension_semantics = [#tpu.dimension_semantics<parallel>], iteration_bounds = array<i64: 2>, scalar_prefetch = 0 : i64, scratch_operands = 0 : i64, tpu.core_type = #tpu.core_type<tc>, window_params = [{transform_indices = @transform_0, window_bounds = array<i64: 128, 36>}, {pipeline_mode = #tpu.pipeline_mode<synchronous>, transform_indices = @transform_1, window_bounds = array<i64: 36, 128>}, {pipeline_mode = #tpu.pipeline_mode<synchronous>, transform_indices = @transform_2, window_bounds = array<i64: 3, 128, 128>}, {pipeline_mode = #tpu.pipeline_mode<synchronous>, transform_indices = @transform_3, window_bounds = array<i64: 128, 128>}, {pipeline_mode = #tpu.pipeline_mode<synchronous>, transform_indices = @transform_4, window_bounds = array<i64: 36, 256>}, {pipeline_mode = #tpu.pipeline_mode<synchronous>, transform_indices = @transform_5, window_bounds = array<i64: 4, 1, 128>}, {transform_indices = @transform_6, window_bounds = array<i64: 128, 128>}]} {
    %c0 = arith.constant 0 : index
    %c0_0 = arith.constant 0 : index
    %0 = vector.load %arg1[%c0, %c0_0] : memref<128x36xbf16, #tpu.memory_space<vmem>>, vector<128x36xbf16>
    %c0_1 = arith.constant 0 : index
    %c0_2 = arith.constant 0 : index
    %1 = vector.load %arg2[%c0_1, %c0_2] : memref<36x128xbf16, #tpu.memory_space<vmem>>, vector<36x128xbf16>
    %c0_3 = arith.constant 0 : index
    %c0_4 = arith.constant 0 : index
    %c0_5 = arith.constant 0 : index
    %2 = vector.load %arg3[%c0_3, %c0_4, %c0_5] : memref<3x128x128xbf16, #tpu.memory_space<vmem>>, vector<3x128x128xbf16>
    %c0_6 = arith.constant 0 : index
    %c0_7 = arith.constant 0 : index
    %3 = vector.load %arg4[%c0_6, %c0_7] : memref<128x128xbf16, #tpu.memory_space<vmem>>, vector<128x128xbf16>
    %c0_8 = arith.constant 0 : index
    %c0_9 = arith.constant 0 : index
    %4 = vector.load %arg5[%c0_8, %c0_9] : memref<36x256xbf16, #tpu.memory_space<vmem>>, vector<36x256xbf16>
    %c0_10 = arith.constant 0 : index
    %c0_11 = arith.constant 0 : index
    %c0_12 = arith.constant 0 : index
    %5 = vector.load %arg6[%c0_10, %c0_11, %c0_12] : memref<4x1x128xf32, #tpu.memory_space<vmem>>, vector<4x1x128xf32>
    %cst = arith.constant dense<0.000000e+00> : vector<128x128xf32>
    %6 = tpu.matmul %0, %1, %cst {dimension_numbers = #tpu.dot_dimension_numbers<[1], [0], [0], [1], [0, 0, 1, 1], [], []>} : vector<128x36xbf16>, vector<36x128xbf16>, vector<128x128xf32> -> vector<128x128xf32>
    %7 = vector.extract_strided_slice %5 {offsets = [0, 0, 0], sizes = [1, 1, 128], strides = [1, 1, 1]} : vector<4x1x128xf32> to vector<1x1x128xf32>
    %8 = vector.shape_cast %7 : vector<1x1x128xf32> to vector<1x128xf32>
    %9 = vector.broadcast %8 : vector<1x128xf32> to vector<128x128xf32>
    %10 = arith.addf %6, %9 : vector<128x128xf32>
    %cst_13 = arith.constant 0.000000e+00 : f32
    %11 = vector.broadcast %cst_13 : f32 to vector<128x128xf32>
    %12 = arith.maximumf %10, %11 : vector<128x128xf32>
    %13 = arith.truncf %12 : vector<128x128xf32> to vector<128x128xbf16>
    %14 = vector.extract_strided_slice %2 {offsets = [0, 0, 0], sizes = [1, 128, 128], strides = [1, 1, 1]} : vector<3x128x128xbf16> to vector<1x128x128xbf16>
    %15 = vector.shape_cast %14 : vector<1x128x128xbf16> to vector<128x128xbf16>
    %cst_14 = arith.constant dense<0.000000e+00> : vector<128x128xf32>
    %16 = tpu.matmul %13, %15, %cst_14 {dimension_numbers = #tpu.dot_dimension_numbers<[1], [0], [0], [1], [0, 0, 1, 1], [], []>} : vector<128x128xbf16>, vector<128x128xbf16>, vector<128x128xf32> -> vector<128x128xf32>
    %17 = vector.extract_strided_slice %5 {offsets = [1, 0, 0], sizes = [1, 1, 128], strides = [1, 1, 1]} : vector<4x1x128xf32> to vector<1x1x128xf32>
    %18 = vector.shape_cast %17 : vector<1x1x128xf32> to vector<1x128xf32>
    %19 = vector.broadcast %18 : vector<1x128xf32> to vector<128x128xf32>
    %20 = arith.addf %16, %19 : vector<128x128xf32>
    %cst_15 = arith.constant 0.000000e+00 : f32
    %21 = vector.broadcast %cst_15 : f32 to vector<128x128xf32>
    %22 = arith.maximumf %20, %21 : vector<128x128xf32>
    %23 = arith.truncf %22 : vector<128x128xf32> to vector<128x128xbf16>
    %24 = vector.extract_strided_slice %2 {offsets = [1, 0, 0], sizes = [1, 128, 128], strides = [1, 1, 1]} : vector<3x128x128xbf16> to vector<1x128x128xbf16>
    %25 = vector.shape_cast %24 : vector<1x128x128xbf16> to vector<128x128xbf16>
    %cst_16 = arith.constant dense<0.000000e+00> : vector<128x128xf32>
    %26 = tpu.matmul %23, %25, %cst_16 {dimension_numbers = #tpu.dot_dimension_numbers<[1], [0], [0], [1], [0, 0, 1, 1], [], []>} : vector<128x128xbf16>, vector<128x128xbf16>, vector<128x128xf32> -> vector<128x128xf32>
    %27 = vector.extract_strided_slice %5 {offsets = [2, 0, 0], sizes = [1, 1, 128], strides = [1, 1, 1]} : vector<4x1x128xf32> to vector<1x1x128xf32>
    %28 = vector.shape_cast %27 : vector<1x1x128xf32> to vector<1x128xf32>
    %29 = vector.broadcast %28 : vector<1x128xf32> to vector<128x128xf32>
    %30 = arith.addf %26, %29 : vector<128x128xf32>
    %cst_17 = arith.constant 0.000000e+00 : f32
    %31 = vector.broadcast %cst_17 : f32 to vector<128x128xf32>
    %32 = arith.maximumf %30, %31 : vector<128x128xf32>
    %33 = arith.truncf %32 : vector<128x128xf32> to vector<128x128xbf16>
    %34 = vector.extract_strided_slice %2 {offsets = [2, 0, 0], sizes = [1, 128, 128], strides = [1, 1, 1]} : vector<3x128x128xbf16> to vector<1x128x128xbf16>
    %35 = vector.shape_cast %34 : vector<1x128x128xbf16> to vector<128x128xbf16>
    %cst_18 = arith.constant dense<0.000000e+00> : vector<128x128xf32>
    %36 = tpu.matmul %33, %35, %cst_18 {dimension_numbers = #tpu.dot_dimension_numbers<[1], [0], [0], [1], [0, 0, 1, 1], [], []>} : vector<128x128xbf16>, vector<128x128xbf16>, vector<128x128xf32> -> vector<128x128xf32>
    %37 = vector.extract_strided_slice %5 {offsets = [3, 0, 0], sizes = [1, 1, 128], strides = [1, 1, 1]} : vector<4x1x128xf32> to vector<1x1x128xf32>
    %38 = vector.shape_cast %37 : vector<1x1x128xf32> to vector<1x128xf32>
    %39 = vector.broadcast %38 : vector<1x128xf32> to vector<128x128xf32>
    %40 = arith.addf %36, %39 : vector<128x128xf32>
    %cst_19 = arith.constant 0.000000e+00 : f32
    %41 = vector.broadcast %cst_19 : f32 to vector<128x128xf32>
    %42 = arith.maximumf %40, %41 : vector<128x128xf32>
    %cst_20 = arith.constant dense<0.000000e+00> : vector<128x256xf32>
    %43 = tpu.matmul %0, %4, %cst_20 {dimension_numbers = #tpu.dot_dimension_numbers<[1], [0], [0], [1], [0, 0, 1, 1], [], []>} : vector<128x36xbf16>, vector<36x256xbf16>, vector<128x256xf32> -> vector<128x256xf32>
    %44 = vector.extract_strided_slice %43 {offsets = [0, 0], sizes = [128, 128], strides = [1, 1]} : vector<128x256xf32> to vector<128x128xf32>
    %cst_21 = arith.constant 5.000000e-01 : f32
    %45 = vector.broadcast %cst_21 : f32 to vector<128x128xf32>
    %46 = arith.cmpf ogt, %44, %45 : vector<128x128xf32>
    %cst_22 = arith.constant 0.000000e+00 : f32
    %47 = vector.broadcast %cst_22 : f32 to vector<128x128xf32>
    %48 = arith.select %46, %42, %47 : vector<128x128xi1>, vector<128x128xf32>
    %49 = arith.truncf %48 : vector<128x128xf32> to vector<128x128xbf16>
    %cst_23 = arith.constant dense<0.000000e+00> : vector<128x128xf32>
    %50 = tpu.matmul %49, %3, %cst_23 {dimension_numbers = #tpu.dot_dimension_numbers<[1], [0], [0], [1], [0, 0, 1, 1], [], []>} : vector<128x128xbf16>, vector<128x128xbf16>, vector<128x128xf32> -> vector<128x128xf32>
    %51 = vector.extract_strided_slice %43 {offsets = [0, 128], sizes = [128, 128], strides = [1, 1]} : vector<128x256xf32> to vector<128x128xf32>
    %52 = arith.addf %50, %51 : vector<128x128xf32>
    %c0_24 = arith.constant 0 : index
    %c0_25 = arith.constant 0 : index
    %53 = vector.load %arg7[%c0_24, %c0_25] : memref<128x128xf32, #tpu.memory_space<vmem>>, vector<128x128xf32>
    tpu.vector_store %arg7[%c0_24, %c0_25], %52 {strides = array<i32>} : memref<128x128xf32, #tpu.memory_space<vmem>>, vector<128x128xf32>,
    return
  }
  func.func @transform_0(%arg0: i32) -> (i32, i32) {
    %c0_i32 = arith.constant 0 : i32
    %c0_i32_0 = arith.constant 0 : i32
    return %arg0, %c0_i32 : i32, i32
  }
  func.func @transform_1(%arg0: i32) -> (i32, i32) {
    %c0_i32 = arith.constant 0 : i32
    %c0_i32_0 = arith.constant 0 : i32
    %c0_i32_1 = arith.constant 0 : i32
    return %c0_i32, %c0_i32_0 : i32, i32
  }
  func.func @transform_2(%arg0: i32) -> (i32, i32, i32) {
    %c0_i32 = arith.constant 0 : i32
    %c0_i32_0 = arith.constant 0 : i32
    %c0_i32_1 = arith.constant 0 : i32
    %c0_i32_2 = arith.constant 0 : i32
    return %c0_i32, %c0_i32_0, %c0_i32_1 : i32, i32, i32
  }
  func.func @transform_3(%arg0: i32) -> (i32, i32) {
    %c0_i32 = arith.constant 0 : i32
    %c0_i32_0 = arith.constant 0 : i32
    %c0_i32_1 = arith.constant 0 : i32
    return %c0_i32, %c0_i32_0 : i32, i32
  }
  func.func @transform_4(%arg0: i32) -> (i32, i32) {
    %c0_i32 = arith.constant 0 : i32
    %c0_i32_0 = arith.constant 0 : i32
    %c0_i32_1 = arith.constant 0 : i32
    return %c0_i32, %c0_i32_0 : i32, i32
  }
  func.func @transform_5(%arg0: i32) -> (i32, i32, i32) {
    %c0_i32 = arith.constant 0 : i32
    %c0_i32_0 = arith.constant 0 : i32
    %c0_i32_1 = arith.constant 0 : i32
    %c0_i32_2 = arith.constant 0 : i32
    return %c0_i32, %c0_i32_0, %c0_i32_1 : i32, i32, i32
  }
  func.func @transform_6(%arg0: i32) -> (i32, i32) {
    %c0_i32 = arith.constant 0 : i32
    %c0_i32_0 = arith.constant 0 : i32
    return %arg0, %c0_i32 : i32, i32
  }
}

</mosaic_0001>

<bundles_post_ra>
// kernel: agent_network_forward.1
= control target key start
LH: loop header
LB: loop body
LE: loop exit
PB: predicated region body
PF: predicated region fallthrough
CT: control target
= control target key end

     0   :  { %s1914_s21 = smov 0   ;;  %s2279_s0 = inlined_call_operand.vmem [shape: bf16[256,36], index: 0, kind: input, shape index: {}]   ;;  %s2280_s1 = inlined_call_operand.vmem [shape: bf16[36,128], index: 1, kind: input, shape index: {}]   ;;  %s2281_s2 = inlined_call_operand.vmem [shape: bf16[3,128,128], index: 2, kind: input, shape index: {}]   ;;  %s2282_s3 = inlined_call_operand.vmem [shape: bf16[128,128], index: 3, kind: input, shape index: {}]   ;;  %s2283_s4 = inlined_call_operand.vmem [shape: bf16[36,256], index: 4, kind: input, shape index: {}]   ;;  %s2284_s5 = inlined_call_operand.vmem [shape: f32[4,1,128], index: 5, kind: input, shape index: {}]   ;;  %s2285_s6 = inlined_call_operand.vmem [shape: f32[256,128], index: 6, kind: output, shape index: {}]  }
   0x1 LB: > { %s1479_s22 = sadd.s32 4294967295, %s1876_s21   ;;  %p1483_p0 = scmp.ge.s32.totalorder %s1876_s21, 1  ;;  %s1876_s21 = sphi %s1914_s21, %s16_s21  }
   0x2   : > { %p213_p1 = scmp.lt.s32.totalorder %s1876_s21, 3 }
   0x4   : > { %p214_p2 = pnand %p1483_p0, %p213_p1 }
   0x5   : > { %v1819_v0 = vld [vmem:[%s2280_s1] sm:$0xff] (!%p214_p2)   ;;  %v1820_v1 = vld [vmem:[%s2280_s1 + $0x8] sm:$0xff] (!%p214_p2)   ;;  %s1484_s27 = sshll.u32 (!%p214_p2), %s1479_s22, 4  ;;  %v1821_v2 = vld [vmem:[%s2280_s1 + $0x10] ss:$0 sps:$4 sm:$0x33] (!%p214_p2)  }
   0x6   : > { %217 = sbr.rel (%p214_p2) target bundleno = 1148 (0x47c), region = 44  ;;  %1659 = vmatprep.subr.bf16.mxu0 (!%p214_p2), %v1819_v0  ;;  %p244_p3 = scmp.lt.s32.totalorder (!%p214_p2), %s1484_s27, 31  ;;  %v1830_v3 = vld [vmem:[%s2281_s2] sm:$0xff] (!%p214_p2)   ;;  %vm436_vm0 = vcmask (!%p214_p2), 1041408   ;;  %v1831_v4 = vld [vmem:[%s2281_s2 + $0x8] sm:$0xff] (!%p214_p2)   ;;  %vm411_vm1 = vcmask (!%p214_p2), 293888  }
   0x7   : > { %1660 = vmatpush3.bf16.msra.mxu0 (!%p214_p2), %v1819_v0  ;;  %1681 = vmatprep.subr.bf16.mxu1 (!%p214_p2), %v1830_v3  ;;  %v1832_v5 = vld [vmem:[%s2281_s2 + $0x10] sm:$0xff] (!%p214_p2)   ;;  %v438_v6 = vsel (!%p214_p2), %vm436_vm0, %v1821_v2, 0  ;;  %v1833_v8 = vld [vmem:[%s2281_s2 + $0x18] sm:$0xff] (!%p214_p2)   ;;  %v1834_v12 = vld [vmem:[%s2281_s2 + $0x20] sm:$0xff] (!%p214_p2)  }
   0x8   : > { %1661 = vmatprep.subr.bf16.mxu0 (!%p214_p2), %v1820_v1  ;;  %1682 = vmatpush3.bf16.msra.mxu1 (!%p214_p2), %v1830_v3  ;;  %v1835_v14 = vld [vmem:[%s2281_s2 + $0x28] sm:$0xff] (!%p214_p2)   ;;  %v1836_v18 = vld [vmem:[%s2281_s2 + $0x30] sm:$0xff] (!%p214_p2)   ;;  %v1837_v19 = vld [vmem:[%s2281_s2 + $0x38] sm:$0xff] (!%p214_p2)  }
   0x9   : > { %1683 = vmatprep.subr.bf16.mxu1 (!%p214_p2), %v1831_v4  ;;  %v1838_v20 = vld [vmem:[%s2281_s2 + $0x40] sm:$0xff] (!%p214_p2)   ;;  %v1839_v21 = vld [vmem:[%s2281_s2 + $0x48] sm:$0xff] (!%p214_p2)   ;;  %v1840_v22 = vld [vmem:[%s2281_s2 + $0x50] sm:$0xff] (!%p214_p2)  }
   0xa   : > { %v1841_v23 = vld [vmem:[%s2281_s2 + $0x58] sm:$0xff] (!%p214_p2)   ;;  %v1842_v24 = vld [vmem:[%s2281_s2 + $0x60] sm:$0xff] (!%p214_p2)   ;;  %v1843_v25 = vld [vmem:[%s2281_s2 + $0x68] sm:$0xff] (!%p214_p2)  }
   0xb   : > { %1662 = vmatpush3.bf16.msra.mxu0 (!%p214_p2), %v1820_v1  ;;  %v1488_v26 = vld [vmem:[%s2284_s5] ss:$0 sm:$0xff] (!%p214_p2) }
   0xc   : > { %1809 = vmatprep.subr.msk.bf16.mxu0 (!%p214_p2), %vm436_vm0, %v1821_v2  ;;  %1684 = vmatpush3.bf16.msra.mxu1 (!%p214_p2), %v1831_v4 }
   0xd   : > { %s2303_s27 = smov (!%p244_p3, %s1484_s27), 31  ;;  %1685 = vmatprep.subr.bf16.mxu1 %v1832_v5 }
   0xe   : > { %s1485_s10 = sshll.u32 %s2303_s27, 2  ;;  %s1487_s28 = sshll.u32 %s2303_s27, 3 }
   0xf   : > { %s1943_s13 = scalar_lea.vmem %s2279_s0, %s1485_s10  ;;  %1664 = vmatpush3.bf16.msra.mxu0 %v438_v6  ;;  %s2242_s7 = scalar_lea.vmem %s2285_s6, %s1487_s28 }
  0x10   : > { %v1951_v7 = vld [vmem:[%s1943_s13] sm:$0xff]   ;;  %v1959_v9 = vld [vmem:[%s1943_s13 + $0x8] sm:$0xff]   ;;  %v1962_v10 = vld [vmem:[%s1943_s13 + $0x10] sm:$0xff]   ;;  %1686 = vmatpush3.bf16.msra.mxu1 %v1832_v5  ;;  %1713 = vmatprep.subr.bf16.mxu0 %v1838_v20 }
  0x11   : > { %1665 = vmatprep.mubr.msk.bf16.mxu0 %vm411_vm1, %v1951_v7  ;;  %1687 = vmatprep.subr.bf16.mxu1 %v1833_v8  ;;  %v1969_v11 = vld [vmem:[%s1943_s13 + $0x18] sm:$0xff]   ;;  %v1975_v13 = vld [vmem:[%s1943_s13 + $0x20] sm:$0xff]   ;;  %v1985_v15 = vld [vmem:[%s1943_s13 + $0x28] sm:$0xff]  }
  0x12   : > { %1666 = vmatmul.mubr.msk.bf16.vlgmr.msra.gmra.mrb[0].mxu0 %vm411_vm1, %v1959_v9  ;;  %v1988_v16 = vld [vmem:[%s1943_s13 + $0x30] sm:$0xff]   ;;  %v1995_v17 = vld [vmem:[%s1943_s13 + $0x38] sm:$0xff]  }
  0x13   : > { %1669 = vmatprep.mubr.msk.bf16.mxu0 %vm411_vm1, %v1962_v10  ;;  %1714 = vmatpush3.bf16.msra.mxu0 %v1838_v20 }
  0x14   : > { %1688 = vmatpush3.bf16.msra.mxu1 %v1833_v8  ;;  %1715 = vmatprep.subr.bf16.mxu0 %v1839_v21 }
  0x15   : > { %1689 = vmatprep.subr.bf16.mxu1 %v1834_v12 }
  0x17   : > { %1716 = vmatpush3.bf16.msra.mxu0 %v1839_v21 }
  0x18   : > { %1690 = vmatpush3.bf16.msra.mxu1 %v1834_v12  ;;  %1717 = vmatprep.subr.bf16.mxu0 %v1840_v22 }
  0x19   : > { %1691 = vmatprep.subr.bf16.mxu1 %v1835_v14 }
  0x1a   : > { %1670 = vmatmul.mubr.msk.bf16.gmra.mrb[4].mxu0 %vm411_vm1, %v1969_v11 }
  0x1b   : > { %1673 = vmatprep.mubr.msk.bf16.mxu0 %vm411_vm1, %v1975_v13  ;;  %1718 = vmatpush3.bf16.msra.mxu0 %v1840_v22 }
  0x1c   : > { %1692 = vmatpush3.bf16.msra.mxu1 %v1835_v14  ;;  %1719 = vmatprep.subr.bf16.mxu0 %v1841_v23 }
  0x1d   : > { %1693 = vmatprep.subr.bf16.mxu1 %v1836_v18 }
  0x1f   : > { %1720 = vmatpush3.bf16.msra.mxu0 %v1841_v23 }
  0x20   : > { %1694 = vmatpush3.bf16.msra.mxu1 %v1836_v18  ;;  %1721 = vmatprep.subr.bf16.mxu0 %v1842_v24 }
  0x21   : > { %1695 = vmatprep.subr.bf16.mxu1 %v1837_v19 }
  0x22   : > { %1674 = vmatmul.mubr.msk.bf16.gmra.mrb[8].mxu0 %vm411_vm1, %v1985_v15 }
  0x23   : > { %1677 = vmatprep.mubr.msk.bf16.mxu0 %vm411_vm1, %v1988_v16  ;;  %1722 = vmatpush3.bf16.msra.mxu0 %v1842_v24 }
  0x24   : > { %1696 = vmatpush3.bf16.msra.mxu1 %v1837_v19  ;;  %1723 = vmatprep.subr.bf16.mxu0 %v1843_v25 }
  0x27   : > { %1724 = vmatpush3.bf16.msra.mxu0 %v1843_v25 }
  0x2a   : > { %1678 = vmatmul.mubr.msk.bf16.gmra.mrb[12].mxu0 %vm411_vm1, %v1995_v17 }
  0xe5   : > { %v1667_v27 = vpop.f32.mrb[0].mxu0 }
  0xe6   : > { %v483_v28 = vadd.f32 %v1667_v27, %v1488_v26  ;;  %v474_v29 = vpop.f32.mrb[1].mxu0 }
  0xe7   : > { %v475_v30 = vadd.f32 %v1488_v26, %v474_v29  ;;  %v1668_v31 = vpop.f32.mrb[2].mxu0  ;;  %v1845_v29 = vld [vmem:[%s2281_s2 + $0x78] sm:$0xff]  }
  0xe8   : > { %v486_v32 = vadd.f32 %v1668_v31, %v1488_v26  ;;  %v477_v33 = vpop.f32.mrb[3].mxu0  ;;  %v539_v35 = vmax.f32 %v483_v28, 0.0  ;;  %v1844_v28 = vld [vmem:[%s2281_s2 + $0x70] sm:$0xff]   ;;  %v1855_v31 = vld [vmem:[%s2281_s2 + $0x88] sm:$0xff]  }
  0xe9   : > { %v478_v34 = vadd.f32 %v1488_v26, %v477_v33  ;;  %v537_v37 = vmax.f32 %v475_v30, 0.0  ;;  %1725 = vmatprep.subr.bf16.mxu0 %v1844_v28  ;;  %v1854_v30 = vld [vmem:[%s2281_s2 + $0x80] sm:$0xff]   ;;  %v1857_v33 = vld [vmem:[%s2281_s2 + $0x98] sm:$0xff]  }
  0xea   : > { %v540_v36 = vmax.f32 %v486_v32, 0.0  ;;  %1726 = vmatpush3.bf16.msra.mxu0 %v1844_v28  ;;  %1745 = vmatprep.subr.bf16.mxu1 %v1854_v30  ;;  %v1856_v32 = vld [vmem:[%s2281_s2 + $0x90] sm:$0xff]  }
  0xeb   : > { %v538_v38 = vmax.f32 %v478_v34, 0.0  ;;  %1727 = vmatprep.subr.bf16.mxu0 %v1845_v29  ;;  %v1858_v34 = vld [vmem:[%s2281_s2 + $0xa0] sm:$0xff]  }
  0xec   : > { %v554_v39 = vpack.c.bf16 %v540_v36, %v539_v35  ;;  %v1859_v35 = vld [vmem:[%s2281_s2 + $0xa8] sm:$0xff]   ;;  %v2056_v36 = vld [vmem:[%s2284_s5 + $0x1] ss:$0 sm:$0xff] }
  0xed   : > { %v1671_v40 = vpop.f32.mrb[4].mxu0  ;;  %v553_v41 = vpack.c.bf16 %v538_v38, %v537_v37 }
  0xee   : > { %v499_v42 = vadd.f32 %v1671_v40, %v1488_v26  ;;  %v490_v43 = vpop.f32.mrb[5].mxu0  ;;  %1728 = vmatpush3.bf16.msra.mxu0 %v1845_v29 }
  0xef   : > { %v491_v44 = vadd.f32 %v1488_v26, %v490_v43  ;;  %v1672_v45 = vpop.f32.mrb[6].mxu0  ;;  %1697 = vmatprep.mubr.bf16.mxu1 %v553_v41 }
  0xf0   : > { %v502_v46 = vadd.f32 %v1672_v45, %v1488_v26  ;;  %v493_v47 = vpop.f32.mrb[7].mxu0  ;;  %1698 = vmatmul.mubr.bf16.vlgmr.msra.gmra.mrb[0].mxu1 %v554_v39  ;;  %v543_v49 = vmax.f32 %v499_v42, 0.0 }
  0xf1   : > { %v494_v48 = vadd.f32 %v1488_v26, %v493_v47  ;;  %v541_v51 = vmax.f32 %v491_v44, 0.0  ;;  %1746 = vmatpush3.bf16.msra.mxu1 %v1854_v30 }
  0xf2   : > { %v544_v50 = vmax.f32 %v502_v46, 0.0  ;;  %1747 = vmatprep.subr.bf16.mxu1 %v1855_v31 }
  0xf3   : > { %v542_v52 = vmax.f32 %v494_v48, 0.0 }
  0xf4   : > { %v556_v53 = vpack.c.bf16 %v544_v50, %v543_v49 }
  0xf5   : > { %v555_v54 = vpack.c.bf16 %v542_v52, %v541_v51  ;;  %v1675_v55 = vpop.f32.mrb[8].mxu0  ;;  %1748 = vmatpush3.bf16.msra.mxu1 %v1855_v31  ;;  %v1846_v52 = vld [vmem:[%s2283_s4] ss:$8 sps:$4 sm:$0xff]  }
  0xf6   : > { %v515_v56 = vadd.f32 %v1675_v55, %v1488_v26  ;;  %v506_v57 = vpop.f32.mrb[9].mxu0  ;;  %1749 = vmatprep.subr.bf16.mxu1 %v1856_v32  ;;  %v1851_v55 = vld [vmem:[%s2283_s4 + $0x14] ss:$8 sps:$4 sm:$0xff]  }
  0xf7   : > { %v507_v58 = vadd.f32 %v1488_v26, %v506_v57  ;;  %v1676_v59 = vpop.f32.mrb[10].mxu0  ;;  %1701 = vmatprep.mubr.bf16.mxu1 %v555_v54 }
  0xf8   : > { %v518_v60 = vadd.f32 %v1676_v59, %v1488_v26  ;;  %v509_v61 = vpop.f32.mrb[11].mxu0  ;;  %1702 = vmatmul.mubr.bf16.gmra.mrb[4].mxu1 %v556_v53  ;;  %v547_v63 = vmax.f32 %v515_v56, 0.0 }
  0xf9   : > { %v510_v62 = vadd.f32 %v1488_v26, %v509_v61  ;;  %v545_v1 = vmax.f32 %v507_v58, 0.0  ;;  %1750 = vmatpush3.bf16.msra.mxu1 %v1856_v32  ;;  %v345_v58 = vld [vmem:[%s2283_s4 + $0x20] sm:$0x33] }
  0xfa   : > { %v548_v0 = vmax.f32 %v518_v60, 0.0  ;;  %1751 = vmatprep.subr.bf16.mxu1 %v1857_v33 }
  0xfb   : > { %v546_v2 = vmax.f32 %v510_v62, 0.0  ;;  %v1849_v62 = vld [vmem:[%s2283_s4 + $0x10] ss:$8 sps:$4 sm:$0xff]  }
  0xfc   : > { %v558_v3 = vpack.c.bf16 %v548_v0, %v547_v63 }
  0xfd   : > { %v557_v4 = vpack.c.bf16 %v546_v2, %v545_v1  ;;  %v1679_v5 = vpop.f32.mrb[12].mxu0  ;;  %1752 = vmatpush3.bf16.msra.mxu1 %v1857_v33  ;;  %v1540_v1 = vcombine.high %v345_v58, %v345_v58  ;;  %v1539_v2 = vcombine.low %v345_v58, %v345_v58  ;;  %v1863_v58 = vld [vmem:[%s2282_s3 + $0x8] sm:$0xff]  }
  0xfe   : > { %v531_v6 = vadd.f32 %v1679_v5, %v1488_v26  ;;  %v522_v8 = vpop.f32.mrb[13].mxu0  ;;  %1753 = vmatprep.subr.bf16.mxu1 %v1858_v34 }
  0xff   : > { %v523_v12 = vadd.f32 %v1488_v26, %v522_v8  ;;  %v1680_v14 = vpop.f32.mrb[14].mxu0  ;;  %1705 = vmatprep.mubr.bf16.mxu1 %v557_v4 }
 0x100   : > { %v534_v18 = vadd.f32 %v1680_v14, %v1488_v26  ;;  %v525_v19 = vpop.f32.mrb[15].mxu0  ;;  %1706 = vmatmul.mubr.bf16.gmra.mrb[8].mxu1 %v558_v3  ;;  %v551_v21 = vmax.f32 %v531_v6, 0.0 }
 0x101   : > { %v526_v20 = vadd.f32 %v1488_v26, %v525_v19  ;;  %v549_v23 = vmax.f32 %v523_v12, 0.0  ;;  %v1848_v26 = vld [vmem:[%s2283_s4 + $0x4] ss:$8 sps:$4 sm:$0xff]   ;;  %1754 = vmatpush3.bf16.msra.mxu1 %v1858_v34 }
 0x102   : > { %v552_v22 = vmax.f32 %v534_v18, 0.0  ;;  %1109 = vmatprep.subr.bf16.mxu0 %v1848_v26  ;;  %1755 = vmatprep.subr.bf16.mxu1 %v1859_v35  ;;  %v1104_v18 = vsel %vm436_vm0, %v1539_v2, 0  ;;  %v1864_v2 = vld [vmem:[%s2282_s3 + $0x10] sm:$0xff]  }
 0x103   : > { %v550_v24 = vmax.f32 %v526_v20, 0.0 }
 0x104   : > { %v560_v25 = vpack.c.bf16 %v552_v22, %v551_v21 }
 0x105   : > { %v559_v27 = vpack.c.bf16 %v550_v24, %v549_v23  ;;  %1756 = vmatpush3.bf16.msra.mxu1 %v1859_v35 }
 0x107   : > { %1709 = vmatprep.mubr.bf16.mxu1 %v559_v27 }
 0x108   : > { %1710 = vmatmul.mubr.bf16.gmra.mrb[12].mxu1 %v560_v25 }
 0x1c3   : > { %v1699_v37 = vpop.f32.mrb[0].mxu1 }
 0x1c4   : > { %v658_v38 = vadd.f32 %v1699_v37, %v2056_v36  ;;  %v649_v39 = vpop.f32.mrb[1].mxu1 }
 0x1c5   : > { %v650_v40 = vadd.f32 %v2056_v36, %v649_v39  ;;  %v1700_v41 = vpop.f32.mrb[2].mxu1 }
 0x1c6   : > { %v661_v42 = vadd.f32 %v1700_v41, %v2056_v36  ;;  %v652_v43 = vpop.f32.mrb[3].mxu1  ;;  %v714_v45 = vmax.f32 %v658_v38, 0.0 }
 0x1c7   : > { %v653_v44 = vadd.f32 %v2056_v36, %v652_v43  ;;  %v712_v47 = vmax.f32 %v650_v40, 0.0 }
 0x1c8   : > { %v715_v46 = vmax.f32 %v661_v42, 0.0 }
 0x1c9   : > { %v713_v48 = vmax.f32 %v653_v44, 0.0 }
 0x1ca   : > { %v729_v49 = vpack.c.bf16 %v715_v46, %v714_v45  ;;  %v1878_v45 = vmov 0  }
 0x1cb   : > { %v728_v50 = vpack.c.bf16 %v713_v48, %v712_v47  ;;  %v1703_v51 = vpop.f32.mrb[4].mxu1 }
 0x1cc   : > { %v674_v53 = vadd.f32 %v1703_v51, %v2056_v36  ;;  %v665_v54 = vpop.f32.mrb[5].mxu1 }
 0x1cd   : > { %v666_v56 = vadd.f32 %v2056_v36, %v665_v54  ;;  %v1704_v57 = vpop.f32.mrb[6].mxu1  ;;  %1729 = vmatprep.mubr.bf16.mxu0 %v728_v50 }
 0x1ce   : > { %v677_v59 = vadd.f32 %v1704_v57, %v2056_v36  ;;  %v668_v60 = vpop.f32.mrb[7].mxu1  ;;  %1730 = vmatmul.mubr.bf16.vlgmr.msra.gmra.mrb[16].mxu0 %v729_v49  ;;  %v718_v63 = vmax.f32 %v674_v53, 0.0 }
 0x1cf   : > { %v669_v61 = vadd.f32 %v2056_v36, %v668_v60  ;;  %1110 = vmatpush1.bf16.msra.mxu0 %v1846_v52  ;;  %v716_v3 = vmax.f32 %v666_v56, 0.0 }
 0x1d0   : > { %v719_v0 = vmax.f32 %v677_v59, 0.0  ;;  %1111 = vmatprep.subr.bf16.mxu0 %v1851_v55 }
 0x1d1   : > { %v717_v4 = vmax.f32 %v669_v61, 0.0 }
 0x1d2   : > { %v731_v5 = vpack.c.bf16 %v719_v0, %v718_v63 }
 0x1d3   : > { %v730_v6 = vpack.c.bf16 %v717_v4, %v716_v3  ;;  %v1707_v8 = vpop.f32.mrb[8].mxu1  ;;  %1112 = vmatpush1.bf16.msra.mxu0 %v1849_v62 }
 0x1d4   : > { %v690_v12 = vadd.f32 %v1707_v8, %v2056_v36  ;;  %v681_v14 = vpop.f32.mrb[9].mxu1  ;;  %1541 = vmatprep.subr.msk.bf16.mxu0 %vm436_vm0, %v1540_v1 }
 0x1d5   : > { %v682_v19 = vadd.f32 %v2056_v36, %v681_v14  ;;  %v1708_v20 = vpop.f32.mrb[10].mxu1  ;;  %1733 = vmatprep.mubr.bf16.mxu0 %v730_v6 }
 0x1d6   : > { %v693_v21 = vadd.f32 %v1708_v20, %v2056_v36  ;;  %v684_v22 = vpop.f32.mrb[11].mxu1  ;;  %1734 = vmatmul.mubr.bf16.gmra.mrb[20].mxu0 %v731_v5  ;;  %v722_v24 = vmax.f32 %v690_v12, 0.0 }
 0x1d7   : > { %v685_v23 = vadd.f32 %v2056_v36, %v684_v22  ;;  %1114 = vmatpush1.bf16.msra.mxu0 %v1104_v18  ;;  %v720_v27 = vmax.f32 %v682_v19, 0.0  ;;  %v1865_v18 = vld [vmem:[%s2282_s3 + $0x18] sm:$0xff]  }
 0x1d8   : > { %v723_v25 = vmax.f32 %v693_v21, 0.0 }
 0x1d9   : > { %v721_v28 = vmax.f32 %v685_v23, 0.0 }
 0x1da   : > { %v733_v29 = vpack.c.bf16 %v723_v25, %v722_v24 }
 0x1db   : > { %v732_v26 = vpack.c.bf16 %v721_v28, %v720_v27  ;;  %v1711_v30 = vpop.f32.mrb[12].mxu1  ;;  %v1866_v27 = vld [vmem:[%s2282_s3 + $0x20] sm:$0xff]  }
 0x1dc   : > { %v706_v31 = vadd.f32 %v1711_v30, %v2056_v36  ;;  %v697_v32 = vpop.f32.mrb[13].mxu1 }
 0x1dd   : > { %v698_v33 = vadd.f32 %v2056_v36, %v697_v32  ;;  %v1712_v34 = vpop.f32.mrb[14].mxu1  ;;  %1737 = vmatprep.mubr.bf16.mxu0 %v732_v26 }
 0x1de   : > { %v709_v35 = vadd.f32 %v1712_v34, %v2056_v36  ;;  %v700_v37 = vpop.f32.mrb[15].mxu1  ;;  %1738 = vmatmul.mubr.bf16.gmra.mrb[24].mxu0 %v733_v29  ;;  %v726_v39 = vmax.f32 %v706_v31, 0.0  ;;  %v1867_v34 = vld [vmem:[%s2282_s3 + $0x28] sm:$0xff]  }
 0x1df   : > { %v701_v38 = vadd.f32 %v2056_v36, %v700_v37  ;;  %v724_v41 = vmax.f32 %v698_v33, 0.0 }
 0x1e0   : > { %v727_v40 = vmax.f32 %v709_v35, 0.0 }
 0x1e1   : > { %v725_v42 = vmax.f32 %v701_v38, 0.0 }
 0x1e2   : > { %v735_v43 = vpack.c.bf16 %v727_v40, %v726_v39 }
 0x1e3   : > { %v734_v44 = vpack.c.bf16 %v725_v42, %v724_v41 }
 0x1e5   : > { %1741 = vmatprep.mubr.bf16.mxu0 %v734_v44 }
 0x1e6   : > { %1742 = vmatmul.mubr.bf16.gmra.mrb[28].mxu0 %v735_v43 }
 0x1e7   : > { %1141 = vmatprep.mubr.bf16.mxu0 %v1878_v45 }
 0x1ee   : > { %1542 = vmatmul.mubr.msk.bf16.vlgmr.msra.gmra.mrb[32].mxu0 %vm411_vm1, %v1951_v7  ;;  %v1860_v7 = vld [vmem:[%s2281_s2 + $0xb0] sm:$0xff]  }
 0x1ef   : > { %1151 = vmatprep.mubr.bf16.mxu0 %v1878_v45  ;;  %1757 = vmatprep.subr.bf16.mxu1 %v1860_v7 }
 0x1f0   : > { %1758 = vmatpush3.bf16.msra.mxu1 %v1860_v7 }
 0x1f6   : > { %1543 = vmatmul.mubr.msk.bf16.gmra.mrb[36].mxu0 %vm411_vm1, %v1959_v9  ;;  %v1861_v9 = vld [vmem:[%s2281_s2 + $0xb8] sm:$0xff]  }
 0x1f7   : > { %1161 = vmatprep.mubr.bf16.mxu0 %v1878_v45  ;;  %1759 = vmatprep.subr.bf16.mxu1 %v1861_v9 }
 0x1f8   : > { %1760 = vmatpush3.bf16.msra.mxu1 %v1861_v9 }
 0x1fe   : > { %1544 = vmatmul.mubr.msk.bf16.gmra.mrb[40].mxu0 %vm411_vm1, %v1962_v10  ;;  %v1862_v10 = vld [vmem:[%s2282_s3] sm:$0xff]  }
 0x1ff   : > { %1171 = vmatprep.mubr.bf16.mxu0 %v1878_v45  ;;  %1777 = vmatprep.subr.bf16.mxu1 %v1862_v10 }
 0x206   : > { %1545 = vmatmul.mubr.msk.bf16.gmra.mrb[44].mxu0 %vm411_vm1, %v1969_v11  ;;  %v2116_v11 = vld [vmem:[%s2284_s5 + $0x2] ss:$0 sm:$0xff] }
 0x207   : > { %1181 = vmatprep.mubr.bf16.mxu0 %v1878_v45 }
 0x20e   : > { %1546 = vmatmul.mubr.msk.bf16.gmra.mrb[48].mxu0 %vm411_vm1, %v1975_v13 }
 0x20f   : > { %1191 = vmatprep.mubr.bf16.mxu0 %v1878_v45 }
 0x216   : > { %1547 = vmatmul.mubr.msk.bf16.gmra.mrb[52].mxu0 %vm411_vm1, %v1985_v15 }
 0x217   : > { %1201 = vmatprep.mubr.bf16.mxu0 %v1878_v45 }
 0x21e   : > { %1548 = vmatmul.mubr.msk.bf16.gmra.mrb[56].mxu0 %vm411_vm1, %v1988_v16 }
 0x21f   : > { %1211 = vmatprep.mubr.bf16.mxu0 %v1878_v45 }
 0x226   : > { %1549 = vmatmul.mubr.msk.bf16.gmra.mrb[60].mxu0 %vm411_vm1, %v1995_v17 }
 0x2a1   : > { %v1731_v13 = vpop.f32.mrb[16].mxu0 }
 0x2a2   : > { %v833_v15 = vadd.f32 %v1731_v13, %v2116_v11  ;;  %v824_v16 = vpop.f32.mrb[17].mxu0 }
 0x2a3   : > { %v825_v36 = vadd.f32 %v2116_v11, %v824_v16  ;;  %v1732_v46 = vpop.f32.mrb[18].mxu0 }
 0x2a4   : > { %v836_v17 = vadd.f32 %v1732_v46, %v2116_v11  ;;  %v827_v47 = vpop.f32.mrb[19].mxu0  ;;  %v889_v49 = vmax.f32 %v833_v15, 0.0 }
 0x2a5   : > { %v828_v48 = vadd.f32 %v2116_v11, %v827_v47  ;;  %v887_v51 = vmax.f32 %v825_v36, 0.0 }
 0x2a6   : > { %v890_v50 = vmax.f32 %v836_v17, 0.0 }
 0x2a7   : > { %v888_v52 = vmax.f32 %v828_v48, 0.0 }
 0x2a8   : > { %v904_v53 = vpack.c.bf16 %v890_v50, %v889_v49 }
 0x2a9   : > { %v903_v54 = vpack.c.bf16 %v888_v52, %v887_v51  ;;  %v1735_v55 = vpop.f32.mrb[20].mxu0 }
 0x2aa   : > { %v849_v56 = vadd.f32 %v1735_v55, %v2116_v11  ;;  %v840_v57 = vpop.f32.mrb[21].mxu0 }
 0x2ab   : > { %v841_v59 = vadd.f32 %v2116_v11, %v840_v57  ;;  %v1736_v60 = vpop.f32.mrb[22].mxu0  ;;  %1761 = vmatprep.mubr.bf16.mxu1 %v903_v54 }
 0x2ac   : > { %v852_v61 = vadd.f32 %v1736_v60, %v2116_v11  ;;  %v843_v62 = vpop.f32.mrb[23].mxu0  ;;  %1762 = vmatmul.mubr.bf16.vlgmr.msra.gmra.mrb[16].mxu1 %v904_v53  ;;  %v893_v0 = vmax.f32 %v849_v56, 0.0 }
 0x2ad   : > { %v844_v63 = vadd.f32 %v2116_v11, %v843_v62  ;;  %1778 = vmatpush3.bf16.msra.mxu1 %v1862_v10  ;;  %v891_v3 = vmax.f32 %v841_v59, 0.0  ;;  %v1869_v62 = vld [vmem:[%s2282_s3 + $0x38] sm:$0xff]  }
 0x2ae   : > { %v894_v1 = vmax.f32 %v852_v61, 0.0  ;;  %1779 = vmatprep.subr.bf16.mxu1 %v1863_v58 }
 0x2af   : > { %v892_v4 = vmax.f32 %v844_v63, 0.0 }
 0x2b0   : > { %v906_v5 = vpack.c.bf16 %v894_v1, %v893_v0 }
 0x2b1   : > { %v905_v6 = vpack.c.bf16 %v892_v4, %v891_v3  ;;  %v1739_v8 = vpop.f32.mrb[24].mxu0  ;;  %1780 = vmatpush3.bf16.msra.mxu1 %v1863_v58  ;;  %v1868_v58 = vld [vmem:[%s2282_s3 + $0x30] sm:$0xff]  }
 0x2b2   : > { %v865_v12 = vadd.f32 %v1739_v8, %v2116_v11  ;;  %v856_v14 = vpop.f32.mrb[25].mxu0  ;;  %1781 = vmatprep.subr.bf16.mxu1 %v1864_v2 }
 0x2b3   : > { %v857_v19 = vadd.f32 %v2116_v11, %v856_v14  ;;  %v1740_v20 = vpop.f32.mrb[26].mxu0  ;;  %1765 = vmatprep.mubr.bf16.mxu1 %v905_v6 }
 0x2b4   : > { %v868_v21 = vadd.f32 %v1740_v20, %v2116_v11  ;;  %v859_v22 = vpop.f32.mrb[27].mxu0  ;;  %1766 = vmatmul.mubr.bf16.gmra.mrb[20].mxu1 %v906_v5  ;;  %v897_v24 = vmax.f32 %v865_v12, 0.0 }
 0x2b5   : > { %v860_v23 = vadd.f32 %v2116_v11, %v859_v22  ;;  %1782 = vmatpush3.bf16.msra.mxu1 %v1864_v2  ;;  %v895_v28 = vmax.f32 %v857_v19, 0.0 }
 0x2b6   : > { %v898_v25 = vmax.f32 %v868_v21, 0.0  ;;  %1783 = vmatprep.subr.bf16.mxu1 %v1865_v18 }
 0x2b7   : > { %v896_v29 = vmax.f32 %v860_v23, 0.0 }
 0x2b8   : > { %v908_v26 = vpack.c.bf16 %v898_v25, %v897_v24  ;;  %v1526_v24 = vld [vmem:[%s2284_s5 + $0x3] ss:$0 sm:$0xff] }
 0x2b9   : > { %v907_v30 = vpack.c.bf16 %v896_v29, %v895_v28  ;;  %v1743_v31 = vpop.f32.mrb[28].mxu0  ;;  %1784 = vmatpush3.bf16.msra.mxu1 %v1865_v18 }
 0x2ba   : > { %v881_v32 = vadd.f32 %v1743_v31, %v2116_v11  ;;  %v872_v33 = vpop.f32.mrb[29].mxu0  ;;  %1785 = vmatprep.subr.bf16.mxu1 %v1866_v27 }
 0x2bb   : > { %v873_v35 = vadd.f32 %v2116_v11, %v872_v33  ;;  %v1744_v37 = vpop.f32.mrb[30].mxu0  ;;  %1769 = vmatprep.mubr.bf16.mxu1 %v907_v30 }
 0x2bc   : > { %v884_v38 = vadd.f32 %v1744_v37, %v2116_v11  ;;  %v875_v39 = vpop.f32.mrb[31].mxu0  ;;  %1770 = vmatmul.mubr.bf16.gmra.mrb[24].mxu1 %v908_v26  ;;  %v901_v41 = vmax.f32 %v881_v32, 0.0 }
 0x2bd   : > { %v876_v40 = vadd.f32 %v2116_v11, %v875_v39  ;;  %1786 = vmatpush3.bf16.msra.mxu1 %v1866_v27  ;;  %v899_v43 = vmax.f32 %v873_v35, 0.0 }
 0x2be   : > { %v902_v42 = vmax.f32 %v884_v38, 0.0  ;;  %1787 = vmatprep.subr.bf16.mxu1 %v1867_v34 }
 0x2bf   : > { %v900_v44 = vmax.f32 %v876_v40, 0.0 }
 0x2c0   : > { %v910_v45 = vpack.c.bf16 %v902_v42, %v901_v41 }
 0x2c1   : > { %v909_v7 = vpack.c.bf16 %v900_v44, %v899_v43  ;;  %v1143_v9 = vpop.f32.mrb[32].mxu0  ;;  %1788 = vmatpush3.bf16.msra.mxu1 %v1867_v34 }
 0x2c2   : > { %vm1222_vm2 = vcmp.gt.f32.partialorder %v1143_v9, 0.5  ;;  %v2149_v10 = vpop.f32.mrb[33].mxu0  ;;  %1789 = vmatprep.subr.bf16.mxu1 %v1868_v58 }
 0x2c3   : > { %1773 = vmatprep.mubr.bf16.mxu1 %v909_v7  ;;  %v1147_v13 = vpop.f32.mrb[34].mxu0 }
 0x2c4   : > { %1774 = vmatmul.mubr.bf16.gmra.mrb[28].mxu1 %v910_v45  ;;  %vm1223_vm3 = vcmp.gt.f32.partialorder %v1147_v13, 0.5  ;;  %v2151_v15 = vpop.f32.mrb[35].mxu0 }
 0x2c5   : > { %vm2153_vm4 = vmpackc.low %vm1223_vm3, %vm1222_vm2  ;;  %1790 = vmatpush3.bf16.msra.mxu1 %v1868_v58 }
 0x2c6   : > { %1791 = vmatprep.subr.bf16.mxu1 %v1869_v62 }
 0x2c9   : > { %v1153_v16 = vpop.f32.mrb[36].mxu0  ;;  %1792 = vmatpush3.bf16.msra.mxu1 %v1869_v62 }
 0x2ca   : > { %vm1224_vm5 = vcmp.gt.f32.partialorder %v1153_v16, 0.5  ;;  %v2157_v36 = vpop.f32.mrb[37].mxu0 }
 0x2cb   : > { %v1157_v46 = vpop.f32.mrb[38].mxu0 }
 0x2cc   : > { %vm1225_vm6 = vcmp.gt.f32.partialorder %v1157_v46, 0.5  ;;  %v2159_v17 = vpop.f32.mrb[39].mxu0 }
 0x2cd   : > { %vm2161_vm7 = vmpackc.low %vm1225_vm6, %vm1224_vm5 }
 0x2d1   : > { %v1163_v48 = vpop.f32.mrb[40].mxu0 }
 0x2d2   : > { %vm1226_vm8 = vcmp.gt.f32.partialorder %v1163_v48, 0.5  ;;  %v2165_v49 = vpop.f32.mrb[41].mxu0 }
 0x2d3   : > { %v1167_v50 = vpop.f32.mrb[42].mxu0 }
 0x2d4   : > { %vm1227_vm9 = vcmp.gt.f32.partialorder %v1167_v50, 0.5  ;;  %v2167_v51 = vpop.f32.mrb[43].mxu0 }
 0x2d5   : > { %vm2169_vm10 = vmpackc.low %vm1227_vm9, %vm1226_vm8 }
 0x2d9   : > { %v1173_v53 = vpop.f32.mrb[44].mxu0 }
 0x2da   : > { %vm1228_vm11 = vcmp.gt.f32.partialorder %v1173_v53, 0.5  ;;  %v2173_v54 = vpop.f32.mrb[45].mxu0 }
 0x2db   : > { %v1177_v55 = vpop.f32.mrb[46].mxu0 }
 0x2dc   : > { %vm1229_vm12 = vcmp.gt.f32.partialorder %v1177_v55, 0.5  ;;  %v2175_v56 = vpop.f32.mrb[47].mxu0 }
 0x2dd   : > { %vm2177_vm13 = vmpackc.low %vm1229_vm12, %vm1228_vm11 }
 0x2e1   : > { %v1183_v59 = vpop.f32.mrb[48].mxu0 }
 0x2e2   : > { %v2184_v60 = vpop.f32.mrb[49].mxu0  ;;  %vm1230_vm14 = vcmp.gt.f32.partialorder %v1183_v59, 0.5 }
 0x2e3   : > { %v1187_v61 = vpop.f32.mrb[50].mxu0 }
 0x2e4   : > { %v2189_v63 = vpop.f32.mrb[51].mxu0  ;;  %vm1231_vm15 = vcmp.gt.f32.partialorder %v1187_v61, 0.5 }
 0x2e5   : > { %vm2191_vm0 = vmpackc.low %vm1231_vm15, %vm1230_vm14 }
 0x2e9   : > { %v1193_v1 = vpop.f32.mrb[52].mxu0 }
 0x2ea   : > { %v2195_v2 = vpop.f32.mrb[53].mxu0  ;;  %vm1232_vm1 = vcmp.gt.f32.partialorder %v1193_v1, 0.5 }
 0x2eb   : > { %v1197_v3 = vpop.f32.mrb[54].mxu0 }
 0x2ec   : > { %v2197_v4 = vpop.f32.mrb[55].mxu0  ;;  %vm1233_vm2 = vcmp.gt.f32.partialorder %v1197_v3, 0.5 }
 0x2ed   : > { %vm2199_vm3 = vmpackc.low %vm1233_vm2, %vm1232_vm1 }
 0x2f1   : > { %v1203_v6 = vpop.f32.mrb[56].mxu0 }
 0x2f2   : > { %v2203_v8 = vpop.f32.mrb[57].mxu0  ;;  %vm1234_vm5 = vcmp.gt.f32.partialorder %v1203_v6, 0.5 }
 0x2f3   : > { %v1207_v12 = vpop.f32.mrb[58].mxu0 }
 0x2f4   : > { %v2205_v14 = vpop.f32.mrb[59].mxu0  ;;  %vm1235_vm6 = vcmp.gt.f32.partialorder %v1207_v12, 0.5 }
 0x2f5   : > { %vm2207_vm8 = vmpackc.low %vm1235_vm6, %vm1234_vm5 }
 0x2f9   : > { %v1213_v19 = vpop.f32.mrb[60].mxu0 }
 0x2fa   : > { %v2211_v20 = vpop.f32.mrb[61].mxu0  ;;  %vm1236_vm9 = vcmp.gt.f32.partialorder %v1213_v19, 0.5 }
 0x2fb   : > { %v1217_v21 = vpop.f32.mrb[62].mxu0 }
 0x2fc   : > { %v2213_v22 = vpop.f32.mrb[63].mxu0  ;;  %vm1237_vm11 = vcmp.gt.f32.partialorder %v1217_v21, 0.5 }
 0x2fd   : > { %vm2215_vm12 = vmpackc.low %vm1237_vm11, %vm1236_vm9 }
 0x37f   : > { %v1763_v25 = vpop.f32.mrb[16].mxu1 }
 0x380   : > { %v1008_v27 = vadd.f32 %v1763_v25, %v1526_v24  ;;  %v999_v28 = vpop.f32.mrb[17].mxu1 }
 0x381   : > { %v1000_v29 = vadd.f32 %v1526_v24, %v999_v28  ;;  %v1764_v26 = vpop.f32.mrb[18].mxu1 }
 0x382   : > { %v1011_v30 = vadd.f32 %v1764_v26, %v1526_v24  ;;  %v1002_v31 = vpop.f32.mrb[19].mxu1  ;;  %v1064_v33 = vmax.f32 %v1008_v27, 0.0 }
 0x383   : > { %v1003_v32 = vadd.f32 %v1526_v24, %v1002_v31  ;;  %v1062_v35 = vmax.f32 %v1000_v29, 0.0 }
 0x384   : > { %v1065_v34 = vmax.f32 %v1011_v30, 0.0 }
 0x385   : > { %v1063_v37 = vmax.f32 %v1003_v32, 0.0 }
 0x386   : > { %v1562_v38 = vpack.c.bf16 %v1065_v34, %v1064_v33 }
 0x387   : > { %v1559_v39 = vpack.c.bf16 %v1063_v37, %v1062_v35  ;;  %v1767_v40 = vpop.f32.mrb[20].mxu1 }
 0x388   : > { %v1024_v41 = vadd.f32 %v1767_v40, %v1526_v24  ;;  %v1015_v42 = vpop.f32.mrb[21].mxu1 }
 0x389   : > { %v1016_v43 = vadd.f32 %v1526_v24, %v1015_v42  ;;  %v1768_v44 = vpop.f32.mrb[22].mxu1  ;;  %1793 = vmatprep.mubr.msk.bf16.mxu1 %vm2153_vm4, %v1559_v39 }
 0x38a   : > { %v1027_v45 = vadd.f32 %v1768_v44, %v1526_v24  ;;  %v1018_v7 = vpop.f32.mrb[23].mxu1  ;;  %1794 = vmatmul.mubr.msk.bf16.vlgmr.msra.gmra.mrb[32].mxu1 %vm2161_vm7, %v1562_v38  ;;  %v1068_v13 = vmax.f32 %v1024_v41, 0.0 }
 0x38b   : > { %v1019_v9 = vadd.f32 %v1526_v24, %v1018_v7  ;;  %v1066_v46 = vmax.f32 %v1016_v43, 0.0 }
 0x38c   : > { %v1069_v16 = vmax.f32 %v1027_v45, 0.0 }
 0x38d   : > { %v1067_v48 = vmax.f32 %v1019_v9, 0.0 }
 0x38e   : > { %v1568_v50 = vpack.c.bf16 %v1069_v16, %v1068_v13 }
 0x38f   : > { %v1565_v53 = vpack.c.bf16 %v1067_v48, %v1066_v46  ;;  %v1771_v55 = vpop.f32.mrb[24].mxu1 }
 0x390   : > { %v1040_v58 = vadd.f32 %v1771_v55, %v1526_v24  ;;  %v1031_v59 = vpop.f32.mrb[25].mxu1 }
 0x391   : > { %v1032_v61 = vadd.f32 %v1526_v24, %v1031_v59  ;;  %v1772_v62 = vpop.f32.mrb[26].mxu1  ;;  %1797 = vmatprep.mubr.msk.bf16.mxu1 %vm2169_vm10, %v1565_v53 }
 0x392   : > { %v1043_v11 = vadd.f32 %v1772_v62, %v1526_v24  ;;  %v1034_v1 = vpop.f32.mrb[27].mxu1  ;;  %1798 = vmatmul.mubr.msk.bf16.gmra.mrb[36].mxu1 %vm2177_vm13, %v1568_v50  ;;  %v1072_v3 = vmax.f32 %v1040_v58, 0.0 }
 0x393   : > { %v1035_v47 = vadd.f32 %v1526_v24, %v1034_v1  ;;  %v1070_v12 = vmax.f32 %v1032_v61, 0.0 }
 0x394   : > { %v1073_v6 = vmax.f32 %v1043_v11, 0.0 }
 0x395   : > { %v1071_v19 = vmax.f32 %v1035_v47, 0.0 }
 0x396   : > { %v1574_v21 = vpack.c.bf16 %v1073_v6, %v1072_v3 }
 0x397   : > { %v1571_v25 = vpack.c.bf16 %v1071_v19, %v1070_v12  ;;  %v1775_v27 = vpop.f32.mrb[28].mxu1 }
 0x398   : > { %v1056_v28 = vadd.f32 %v1775_v27, %v1526_v24  ;;  %v1047_v29 = vpop.f32.mrb[29].mxu1 }
 0x399   : > { %v1048_v26 = vadd.f32 %v1526_v24, %v1047_v29  ;;  %v1776_v30 = vpop.f32.mrb[30].mxu1  ;;  %1801 = vmatprep.mubr.msk.bf16.mxu1 %vm2191_vm0, %v1571_v25 }
 0x39a   : > { %v1059_v52 = vadd.f32 %v1776_v30, %v1526_v24  ;;  %v1050_v31 = vpop.f32.mrb[31].mxu1  ;;  %1802 = vmatmul.mubr.msk.bf16.gmra.mrb[40].mxu1 %vm2199_vm3, %v1574_v21  ;;  %v1076_v32 = vmax.f32 %v1056_v28, 0.0 }
 0x39b   : > { %v1051_v57 = vadd.f32 %v1526_v24, %v1050_v31  ;;  %v1074_v34 = vmax.f32 %v1048_v26, 0.0 }
 0x39c   : > { %v1077_v33 = vmax.f32 %v1059_v52, 0.0 }
 0x39d   : > { %v1075_v35 = vmax.f32 %v1051_v57, 0.0 }
 0x39e   : > { %v1580_v37 = vpack.c.bf16 %v1077_v33, %v1076_v32 }
 0x39f   : > { %v1577_v38 = vpack.c.bf16 %v1075_v35, %v1074_v34 }
 0x3a1   : > { %1805 = vmatprep.mubr.msk.bf16.mxu1 %vm2207_vm8, %v1577_v38 }
 0x3a2   : > { %1806 = vmatmul.mubr.msk.bf16.gmra.mrb[44].mxu1 %vm2215_vm12, %v1580_v37 }
 0x45d   : > { %v1795_v0 = vpop.f32.mrb[32].mxu1 }
 0x45e   : > { %v1353_v5 = vadd.f32 %v1795_v0, %v2157_v36  ;;  %v1344_v24 = vpop.f32.mrb[33].mxu1 }
 0x45f   : > { %v1345_v18 = vadd.f32 %v1344_v24, %v2149_v10  ;;  %v1796_v39 = vpop.f32.mrb[34].mxu1 }
 0x460   : > { %1409 = vst [vmem:[%s2242_s7 + $0x10] sm:$0xff] %v1353_v5  ;;  %v1356_v23 = vadd.f32 %v1796_v39, %v2159_v17  ;;  %v1347_v40 = vpop.f32.mrb[35].mxu1 }
 0x461   : > { %1407 = vst [vmem:[%s2242_s7] sm:$0xff] %v1345_v18  ;;  %v1348_v41 = vadd.f32 %v1347_v40, %v2151_v15 }
 0x462   : > { %1410 = vst [vmem:[%s2242_s7 + $0x18] sm:$0xff] %v1356_v23 }
 0x463   : > { %1408 = vst [vmem:[%s2242_s7 + $0x8] sm:$0xff] %v1348_v41 }
 0x465   : > { %v1799_v42 = vpop.f32.mrb[36].mxu1 }
 0x466   : > { %v1369_v36 = vadd.f32 %v1799_v42, %v2173_v54  ;;  %v1360_v43 = vpop.f32.mrb[37].mxu1 }
 0x467   : > { %v1361_v10 = vadd.f32 %v1360_v43, %v2165_v49  ;;  %v1800_v44 = vpop.f32.mrb[38].mxu1 }
 0x468   : > { %1413 = vst [vmem:[%s2242_s7 + $0x30] sm:$0xff] %v1369_v36  ;;  %v1372_v17 = vadd.f32 %v1800_v44, %v2175_v56  ;;  %v1363_v45 = vpop.f32.mrb[39].mxu1 }
 0x469   : > { %1411 = vst [vmem:[%s2242_s7 + $0x20] sm:$0xff] %v1361_v10  ;;  %v1364_v15 = vadd.f32 %v1363_v45, %v2167_v51 }
 0x46a   : > { %1414 = vst [vmem:[%s2242_s7 + $0x38] sm:$0xff] %v1372_v17 }
 0x46b   : > { %1412 = vst [vmem:[%s2242_s7 + $0x28] sm:$0xff] %v1364_v15 }
 0x46d   : > { %v1803_v7 = vpop.f32.mrb[40].mxu1 }
 0x46e   : > { %v1385_v54 = vadd.f32 %v1803_v7, %v2195_v2  ;;  %v1376_v9 = vpop.f32.mrb[41].mxu1 }
 0x46f   : > { %v1377_v49 = vadd.f32 %v1376_v9, %v2184_v60  ;;  %v1804_v13 = vpop.f32.mrb[42].mxu1 }
 0x470   : > { %1417 = vst [vmem:[%s2242_s7 + $0x50] sm:$0xff] %v1385_v54  ;;  %v1388_v56 = vadd.f32 %v1804_v13, %v2197_v4  ;;  %v1379_v16 = vpop.f32.mrb[43].mxu1 }
 0x471   : > { %1415 = vst [vmem:[%s2242_s7 + $0x40] sm:$0xff] %v1377_v49  ;;  %v1380_v51 = vadd.f32 %v1379_v16, %v2189_v63 }
 0x472   : > { %1418 = vst [vmem:[%s2242_s7 + $0x58] sm:$0xff] %v1388_v56 }
 0x473   : > { %1416 = vst [vmem:[%s2242_s7 + $0x48] sm:$0xff] %v1380_v51 }
 0x475   : > { %v1807_v46 = vpop.f32.mrb[44].mxu1 }
 0x476   : > { %v1401_v2 = vadd.f32 %v1807_v46, %v2211_v20  ;;  %v1392_v48 = vpop.f32.mrb[45].mxu1 }
 0x477   : > { %v1393_v50 = vadd.f32 %v1392_v48, %v2203_v8  ;;  %v1808_v60 = vpop.f32.mrb[46].mxu1 }
 0x478   : > { %1421 = vst [vmem:[%s2242_s7 + $0x70] sm:$0xff] %v1401_v2  ;;  %v1404_v53 = vadd.f32 %v1808_v60, %v2213_v22  ;;  %v1395_v55 = vpop.f32.mrb[47].mxu1 }
 0x479   : > { %1419 = vst [vmem:[%s2242_s7 + $0x60] sm:$0xff] %v1393_v50  ;;  %v1396_v4 = vadd.f32 %v1395_v55, %v2205_v14 }
 0x47a   : > { %1422 = vst [vmem:[%s2242_s7 + $0x78] sm:$0xff] %v1404_v53 }
 0x47b   : > { %1420 = vst [vmem:[%s2242_s7 + $0x68] sm:$0xff] %v1396_v4 }
 0x47c PF: > { %s16_s21 = sadd.s32 1, %s1876_s21  }
 0x47d   : > { %p13_p4 = scmp.ge.s32.totalorder %s16_s21, 4  }
 0x47f   :  { %15 = sbr.rel (!%p13_p4) target bundleno = 1 (0x1), region = 74 }

</bundles_post_ra>
